<compile_context>
chip_gen: v7x
topology: tpu7x:2x2x1
jax: 0.10.0
libtpu: 0.0.40
codegen_flags: <defaults>
</compile_context>

<pallas_src>
import jax
import jax.numpy as jnp
from jax.experimental import pallas as pl
from jax.experimental.pallas import tpu as pltpu

TEMPERATURE = 0.05
_NEG = -1e30  # large-negative (finite) sentinel; avoids -inf/nan arithmetic


def _norm_softmax_loss_kernel(x_ref, o_ref,
                              col_max_ref, col_sum_ref,
                              row_acc_ref, tr_acc_ref):
    pid = pl.program_id(0)
    nsteps = pl.num_programs(0)
    inv_t = jnp.float32(1.0 / TEMPERATURE)

    @pl.when(pid == 0)
    def _init():
        col_max_ref[...] = jnp.full_like(col_max_ref, _NEG)
        col_sum_ref[...] = jnp.zeros_like(col_sum_ref)
        row_acc_ref[...] = jnp.zeros_like(row_acc_ref)
        tr_acc_ref[...] = jnp.zeros_like(tr_acc_ref)

    x = x_ref[...].astype(jnp.float32)          # (TM, N) — note: no x/T copy
    tm, n = x.shape

    # Global row/col indices for this tile; mask rows past N (partial tile).
    grow = pid * tm + jax.lax.broadcasted_iota(jnp.int32, (tm, n), 0)
    gcol = jax.lax.broadcasted_iota(jnp.int32, (tm, n), 1)
    valid = grow < n
    xm = jnp.where(valid, x, _NEG)              # padded/garbage rows -> -1e30

    # --- row-wise logsumexp (log_softmax(x/T, dim=1) denominators) ---------
    m_r = jnp.max(xm, axis=1, keepdims=True)                         # (TM, 1)
    s_r = jnp.sum(jnp.exp((xm - m_r) * inv_t), axis=1, keepdims=True)
    lse_r = m_r * inv_t + jnp.log(s_r)                               # (TM, 1)
    row_valid = (pid * tm
                 + jax.lax.broadcasted_iota(jnp.int32, (tm, 1), 0)) < n
    row_acc_ref[...] = row_acc_ref[...] + jnp.sum(
        jnp.where(row_valid, lse_r, 0.0), keepdims=True)

    # --- diagonal (trace) contribution -------------------------------------
    tr_acc_ref[...] = tr_acc_ref[...] + jnp.sum(
        jnp.where(grow == gcol, xm, 0.0), keepdims=True)

    # --- online column-wise logsumexp (log_softmax(x.T/T, dim=1)) ----------
    cur_max = col_max_ref[...]                                       # (1, N)
    tile_max = jnp.max(xm, axis=0, keepdims=True)
    new_max = jnp.maximum(cur_max, tile_max)
    rescale = jnp.exp((cur_max - new_max) * inv_t)
    tile_sum = jnp.sum(jnp.exp((xm - new_max) * inv_t), axis=0, keepdims=True)
    col_sum_ref[...] = col_sum_ref[...] * rescale + tile_sum
    col_max_ref[...] = new_max

    @pl.when(pid == nsteps - 1)
    def _finalize():
        lse_c = col_max_ref[...] * inv_t + jnp.log(col_sum_ref[...])  # (1, N)
        sum_lse_c = jnp.sum(lse_c, keepdims=True)                     # (1, 1)
        sum_lse_r = row_acc_ref[...]
        trace_t = tr_acc_ref[...] * inv_t
        o_ref[...] = (sum_lse_r + sum_lse_c - 2.0 * trace_t) * (1.0 / n)


def _pick_tile_rows(n, itemsize):
    # 2 double-buffered input tiles of (tm, n) should stay under ~12 MiB so
    # the kernel fits v5e's 16 MiB default scoped-VMEM without flags
    # (v6e/v7x have 32 MiB defaults and simply get more headroom).
    budget = 12 * 1024 * 1024
    tm = budget // max(1, 2 * n * itemsize)
    return int(max(8, min(tm, 1024)))


def norm_softmax_loss(x, *, tile_rows=None):
    """x: (N, N) similarity matrix (f32 or bf16). Returns scalar f32 loss."""
    n, m = x.shape
    assert n == m, "NormSoftmaxLoss expects a square similarity matrix"
    itemsize = jnp.dtype(x.dtype).itemsize

    tm = tile_rows if tile_rows is not None else _pick_tile_rows(n, itemsize)
    tm = min(int(tm), n)
    if tm != n:                       # second-to-last block dim: x8 or full dim
        tm = max(8, tm - tm % 8)
    grid = (pl.cdiv(n, tm),)

    cost = pl.CostEstimate(
        flops=10 * n * n,
        transcendentals=2 * n * n,
        bytes_accessed=n * n * itemsize + 4,
    )

    out = pl.pallas_call(
        _norm_softmax_loss_kernel,
        out_shape=jax.ShapeDtypeStruct((1, 1), jnp.float32),
        grid_spec=pltpu.PrefetchScalarGridSpec(
            num_scalar_prefetch=0,
            grid=grid,
            in_specs=[pl.BlockSpec((tm, n), lambda i: (i, 0))],
            out_specs=pl.BlockSpec((1, 1), lambda i: (0, 0)),
            scratch_shapes=[
                pltpu.VMEM((1, n), jnp.float32),   # running column max
                pltpu.VMEM((1, n), jnp.float32),   # running column exp-sum
                pltpu.VMEM((1, 1), jnp.float32),   # running sum of row LSEs
                pltpu.VMEM((1, 1), jnp.float32),   # running trace
            ],
        ),
        compiler_params=pltpu.CompilerParams(
            dimension_semantics=("arbitrary",)),   # grid axis carries col-LSE
        cost_estimate=cost,
    )(x)
    return out[0, 0]


def _reference(x):
    xs = x.astype(jnp.float32) / TEMPERATURE
    i_logsm = jax.nn.log_softmax(xs, axis=1)
    j_logsm = jax.nn.log_softmax(xs.T, axis=1)
    loss_i = jnp.mean(jnp.diag(i_logsm))
    loss_j = jnp.mean(jnp.diag(j_logsm))
    return -loss_i - loss_j


if __name__ == "__main__":
    key = jax.random.PRNGKey(0)
    k1, k2, k3 = jax.random.split(key, 3)

    # Case 1: small matrix (N=16) -> single tile, grid=(1,).
    x1 = jax.random.normal(k1, (16, 16), dtype=jnp.float32)
    l1 = norm_softmax_loss(x1)
    jax.block_until_ready(l1)
    r1 = _reference(x1)
    assert jnp.allclose(l1, r1, rtol=1e-4, atol=1e-4), (l1, r1)

    # Case 2: multi-tile path (grid=4) exercising the online column LSE.
    x2 = jax.random.normal(k2, (128, 128), dtype=jnp.float32)
    l2 = norm_softmax_loss(x2, tile_rows=32)
    jax.block_until_ready(l2)
    r2 = _reference(x2)
    assert jnp.allclose(l2, r2, rtol=1e-4, atol=1e-4), (l2, r2)

    # Case 3: bf16 similarity matrix accepted directly (halves HBM bytes).
    x3 = jax.random.normal(k3, (64, 64), dtype=jnp.bfloat16)
    l3 = norm_softmax_loss(x3)
    jax.block_until_ready(l3)
    r3 = _reference(x3)
    assert jnp.allclose(l3, r3, rtol=1e-3, atol=1e-3), (l3, r3)

    print("KERNEL_OK")
</pallas_src>

<mosaic_0001>
module attributes {stable_mosaic.version = 11 : i64} {
  func.func @_norm_softmax_loss_kernel(%arg0: i32, %arg1: memref<16x16xf32, #tpu.memory_space<vmem>>, %arg2: memref<1x1xf32, #tpu.memory_space<vmem>>, %arg3: memref<1x16xf32, #tpu.memory_space<vmem>>, %arg4: memref<1x16xf32, #tpu.memory_space<vmem>>, %arg5: memref<1x1xf32, #tpu.memory_space<vmem>>, %arg6: memref<1x1xf32, #tpu.memory_space<vmem>>) attributes {dimension_semantics = [#tpu.dimension_semantics<arbitrary>], iteration_bounds = array<i64: 1>, scalar_prefetch = 0 : i64, scratch_operands = 4 : i64, tpu.core_type = #tpu.core_type<tc>, window_params = [{transform_indices = @transform_0, window_bounds = array<i64: 16, 16>}, {pipeline_mode = #tpu.pipeline_mode<synchronous>, transform_indices = @transform_1, window_bounds = array<i64: 1, 1>}]} {
    %c0_i32 = arith.constant 0 : i32
    %0 = arith.cmpi eq, %arg0, %c0_i32 : i32
    %1 = arith.extui %0 : i1 to i32
    %c0_i32_0 = arith.constant 0 : i32
    %2 = arith.cmpi ne, %1, %c0_i32_0 : i32
    scf.if %2 {
      %cst_36 = arith.constant -1.000000e+30 : f32
      %76 = vector.broadcast %cst_36 : f32 to vector<1x16xf32>
      %c0_37 = arith.constant 0 : index
      %c0_38 = arith.constant 0 : index
      %77 = vector.load %arg3[%c0_37, %c0_38] : memref<1x16xf32, #tpu.memory_space<vmem>>, vector<1x16xf32>
      tpu.vector_store %arg3[%c0_37, %c0_38], %76 {strides = array<i32>} : memref<1x16xf32, #tpu.memory_space<vmem>>, vector<1x16xf32>,
      %cst_39 = arith.constant 0.000000e+00 : f32
      %78 = vector.broadcast %cst_39 : f32 to vector<1x16xf32>
      %c0_40 = arith.constant 0 : index
      %c0_41 = arith.constant 0 : index
      %79 = vector.load %arg4[%c0_40, %c0_41] : memref<1x16xf32, #tpu.memory_space<vmem>>, vector<1x16xf32>
      tpu.vector_store %arg4[%c0_40, %c0_41], %78 {strides = array<i32>} : memref<1x16xf32, #tpu.memory_space<vmem>>, vector<1x16xf32>,
      %cst_42 = arith.constant 0.000000e+00 : f32
      %80 = vector.broadcast %cst_42 : f32 to vector<1x1xf32>
      %c0_43 = arith.constant 0 : index
      %c0_44 = arith.constant 0 : index
      %81 = vector.load %arg5[%c0_43, %c0_44] : memref<1x1xf32, #tpu.memory_space<vmem>>, vector<1x1xf32>
      tpu.vector_store %arg5[%c0_43, %c0_44], %80 {strides = array<i32>} : memref<1x1xf32, #tpu.memory_space<vmem>>, vector<1x1xf32>,
      %cst_45 = arith.constant 0.000000e+00 : f32
      %82 = vector.broadcast %cst_45 : f32 to vector<1x1xf32>
      %c0_46 = arith.constant 0 : index
      %c0_47 = arith.constant 0 : index
      %83 = vector.load %arg6[%c0_46, %c0_47] : memref<1x1xf32, #tpu.memory_space<vmem>>, vector<1x1xf32>
      tpu.vector_store %arg6[%c0_46, %c0_47], %82 {strides = array<i32>} : memref<1x1xf32, #tpu.memory_space<vmem>>, vector<1x1xf32>,
    } else {
    }
    %c0 = arith.constant 0 : index
    %c0_1 = arith.constant 0 : index
    %3 = vector.load %arg1[%c0, %c0_1] : memref<16x16xf32, #tpu.memory_space<vmem>>, vector<16x16xf32>
    %c16_i32 = arith.constant 16 : i32
    %4 = arith.muli %arg0, %c16_i32 : i32
    %5 = tpu.iota {dimensions = array<i32: 0>} : vector<16x16xi32>
    %6 = vector.broadcast %4 : i32 to vector<16x16xi32>
    %7 = arith.addi %6, %5 : vector<16x16xi32>
    %8 = tpu.iota {dimensions = array<i32: 1>} : vector<16x16xi32>
    %c16_i32_2 = arith.constant 16 : i32
    %9 = vector.broadcast %c16_i32_2 : i32 to vector<16x16xi32>
    %10 = arith.cmpi slt, %7, %9 : vector<16x16xi32>
    %cst = arith.constant -1.000000e+30 : f32
    %11 = vector.broadcast %cst : f32 to vector<16x16xf32>
    %12 = arith.select %10, %3, %11 : vector<16x16xi1>, vector<16x16xf32>
    %cst_3 = arith.constant dense<0xFF800000> : vector<16xf32>
    %13 = vector.multi_reduction <maximumf>, %12, %cst_3 [1] : vector<16x16xf32> to vector<16xf32>
    %14 = vector.shape_cast %13 : vector<16xf32> to vector<16x1xf32>
    %15 = vector.broadcast %14 : vector<16x1xf32> to vector<16x16xf32>
    %16 = arith.subf %12, %15 : vector<16x16xf32>
    %cst_4 = arith.constant 2.000000e+01 : f32
    %17 = vector.broadcast %cst_4 : f32 to vector<16x16xf32>
    %18 = arith.mulf %16, %17 : vector<16x16xf32>
    %19 = math.exp %18 : vector<16x16xf32>
    %cst_5 = arith.constant dense<0.000000e+00> : vector<16xf32>
    %20 = vector.multi_reduction <add>, %19, %cst_5 [1] : vector<16x16xf32> to vector<16xf32>
    %21 = vector.shape_cast %20 : vector<16xf32> to vector<16x1xf32>
    %cst_6 = arith.constant 2.000000e+01 : f32
    %22 = vector.broadcast %cst_6 : f32 to vector<16x1xf32>
    %23 = arith.mulf %14, %22 : vector<16x1xf32>
    %24 = math.log %21 : vector<16x1xf32>
    %25 = arith.addf %23, %24 : vector<16x1xf32>
    %c16_i32_7 = arith.constant 16 : i32
    %26 = arith.muli %arg0, %c16_i32_7 : i32
    %27 = tpu.iota {dimensions = array<i32: 0>} : vector<16x1xi32>
    %28 = vector.broadcast %26 : i32 to vector<16x1xi32>
    %29 = arith.addi %28, %27 : vector<16x1xi32>
    %c16_i32_8 = arith.constant 16 : i32
    %30 = vector.broadcast %c16_i32_8 : i32 to vector<16x1xi32>
    %31 = arith.cmpi slt, %29, %30 : vector<16x1xi32>
    %c0_9 = arith.constant 0 : index
    %c0_10 = arith.constant 0 : index
    %32 = vector.load %arg5[%c0_9, %c0_10] : memref<1x1xf32, #tpu.memory_space<vmem>>, vector<1x1xf32>
    %cst_11 = arith.constant 0.000000e+00 : f32
    %33 = vector.broadcast %cst_11 : f32 to vector<16x1xf32>
    %34 = arith.select %31, %25, %33 : vector<16x1xi1>, vector<16x1xf32>
    %35 = vector.shape_cast %34 : vector<16x1xf32> to vector<1x16x1xf32>
    %cst_12 = arith.constant dense<0.000000e+00> : vector<1xf32>
    %36 = vector.multi_reduction <add>, %35, %cst_12 [1, 2] : vector<1x16x1xf32> to vector<1xf32>
    %37 = vector.shape_cast %36 : vector<1xf32> to vector<1x1x1xf32>
    %38 = vector.extract %37[0, 0, 0] : f32 from vector<1x1x1xf32>
    %39 = vector.broadcast %38 : f32 to vector<1x1xf32>
    %40 = arith.addf %32, %39 : vector<1x1xf32>
    %c0_13 = arith.constant 0 : index
    %c0_14 = arith.constant 0 : index
    %41 = vector.load %arg5[%c0_13, %c0_14] : memref<1x1xf32, #tpu.memory_space<vmem>>, vector<1x1xf32>
    tpu.vector_store %arg5[%c0_13, %c0_14], %40 {strides = array<i32>} : memref<1x1xf32, #tpu.memory_space<vmem>>, vector<1x1xf32>,
    %c0_15 = arith.constant 0 : index
    %c0_16 = arith.constant 0 : index
    %42 = vector.load %arg6[%c0_15, %c0_16] : memref<1x1xf32, #tpu.memory_space<vmem>>, vector<1x1xf32>
    %43 = arith.cmpi eq, %7, %8 : vector<16x16xi32>
    %cst_17 = arith.constant 0.000000e+00 : f32
    %44 = vector.broadcast %cst_17 : f32 to vector<16x16xf32>
    %45 = arith.select %43, %12, %44 : vector<16x16xi1>, vector<16x16xf32>
    %46 = vector.shape_cast %45 : vector<16x16xf32> to vector<1x16x16xf32>
    %cst_18 = arith.constant dense<0.000000e+00> : vector<1xf32>
    %47 = vector.multi_reduction <add>, %46, %cst_18 [1, 2] : vector<1x16x16xf32> to vector<1xf32>
    %48 = vector.shape_cast %47 : vector<1xf32> to vector<1x1x1xf32>
    %49 = vector.extract %48[0, 0, 0] : f32 from vector<1x1x1xf32>
    %50 = vector.broadcast %49 : f32 to vector<1x1xf32>
    %51 = arith.addf %42, %50 : vector<1x1xf32>
    %c0_19 = arith.constant 0 : index
    %c0_20 = arith.constant 0 : index
    %52 = vector.load %arg6[%c0_19, %c0_20] : memref<1x1xf32, #tpu.memory_space<vmem>>, vector<1x1xf32>
    tpu.vector_store %arg6[%c0_19, %c0_20], %51 {strides = array<i32>} : memref<1x1xf32, #tpu.memory_space<vmem>>, vector<1x1xf32>,
    %c0_21 = arith.constant 0 : index
    %c0_22 = arith.constant 0 : index
    %53 = vector.load %arg3[%c0_21, %c0_22] : memref<1x16xf32, #tpu.memory_space<vmem>>, vector<1x16xf32>
    %cst_23 = arith.constant dense<0xFF800000> : vector<16xf32>
    %54 = vector.multi_reduction <maximumf>, %12, %cst_23 [0] : vector<16x16xf32> to vector<16xf32>
    %55 = vector.shape_cast %54 : vector<16xf32> to vector<1x16xf32>
    %56 = arith.maximumf %53, %55 : vector<1x16xf32>
    %57 = arith.subf %53, %56 : vector<1x16xf32>
    %cst_24 = arith.constant 2.000000e+01 : f32
    %58 = vector.broadcast %cst_24 : f32 to vector<1x16xf32>
    %59 = arith.mulf %57, %58 : vector<1x16xf32>
    %60 = math.exp %59 : vector<1x16xf32>
    %61 = vector.broadcast %56 : vector<1x16xf32> to vector<16x16xf32>
    %62 = arith.subf %12, %61 : vector<16x16xf32>
    %cst_25 = arith.constant 2.000000e+01 : f32
    %63 = vector.broadcast %cst_25 : f32 to vector<16x16xf32>
    %64 = arith.mulf %62, %63 : vector<16x16xf32>
    %65 = math.exp %64 : vector<16x16xf32>
    %cst_26 = arith.constant dense<0.000000e+00> : vector<16xf32>
    %66 = vector.multi_reduction <add>, %65, %cst_26 [0] : vector<16x16xf32> to vector<16xf32>
    %67 = vector.shape_cast %66 : vector<16xf32> to vector<1x16xf32>
    %c0_27 = arith.constant 0 : index
    %c0_28 = arith.constant 0 : index
    %68 = vector.load %arg4[%c0_27, %c0_28] : memref<1x16xf32, #tpu.memory_space<vmem>>, vector<1x16xf32>
    %69 = arith.mulf %68, %60 : vector<1x16xf32>
    %70 = arith.addf %69, %67 : vector<1x16xf32>
    %c0_29 = arith.constant 0 : index
    %c0_30 = arith.constant 0 : index
    %71 = vector.load %arg4[%c0_29, %c0_30] : memref<1x16xf32, #tpu.memory_space<vmem>>, vector<1x16xf32>
    tpu.vector_store %arg4[%c0_29, %c0_30], %70 {strides = array<i32>} : memref<1x16xf32, #tpu.memory_space<vmem>>, vector<1x16xf32>,
    %c0_31 = arith.constant 0 : index
    %c0_32 = arith.constant 0 : index
    %72 = vector.load %arg3[%c0_31, %c0_32] : memref<1x16xf32, #tpu.memory_space<vmem>>, vector<1x16xf32>
    tpu.vector_store %arg3[%c0_31, %c0_32], %56 {strides = array<i32>} : memref<1x16xf32, #tpu.memory_space<vmem>>, vector<1x16xf32>,
    %c0_i32_33 = arith.constant 0 : i32
    %73 = arith.cmpi eq, %arg0, %c0_i32_33 : i32
    %74 = arith.extui %73 : i1 to i32
    %cst_34 = arith.constant 2.000000e+01 : f32
    %c0_i32_35 = arith.constant 0 : i32
    %75 = arith.cmpi ne, %74, %c0_i32_35 : i32
    scf.if %75 {
      %c0_36 = arith.constant 0 : index
      %c0_37 = arith.constant 0 : index
      %76 = vector.load %arg3[%c0_36, %c0_37] : memref<1x16xf32, #tpu.memory_space<vmem>>, vector<1x16xf32>
      %77 = vector.broadcast %cst_34 : f32 to vector<1x16xf32>
      %78 = arith.mulf %76, %77 : vector<1x16xf32>
      %c0_38 = arith.constant 0 : index
      %c0_39 = arith.constant 0 : index
      %79 = vector.load %arg4[%c0_38, %c0_39] : memref<1x16xf32, #tpu.memory_space<vmem>>, vector<1x16xf32>
      %80 = math.log %79 : vector<1x16xf32>
      %81 = arith.addf %78, %80 : vector<1x16xf32>
      %82 = vector.shape_cast %81 : vector<1x16xf32> to vector<1x1x16xf32>
      %cst_40 = arith.constant dense<0.000000e+00> : vector<1xf32>
      %83 = vector.multi_reduction <add>, %82, %cst_40 [1, 2] : vector<1x1x16xf32> to vector<1xf32>
      %84 = vector.shape_cast %83 : vector<1xf32> to vector<1x1x1xf32>
      %85 = vector.extract %84[0, 0, 0] : f32 from vector<1x1x1xf32>
      %86 = vector.broadcast %85 : f32 to vector<1x1xf32>
      %c0_41 = arith.constant 0 : index
      %c0_42 = arith.constant 0 : index
      %87 = vector.load %arg5[%c0_41, %c0_42] : memref<1x1xf32, #tpu.memory_space<vmem>>, vector<1x1xf32>
      %c0_43 = arith.constant 0 : index
      %c0_44 = arith.constant 0 : index
      %88 = vector.load %arg6[%c0_43, %c0_44] : memref<1x1xf32, #tpu.memory_space<vmem>>, vector<1x1xf32>
      %89 = vector.broadcast %cst_34 : f32 to vector<1x1xf32>
      %90 = arith.mulf %88, %89 : vector<1x1xf32>
      %91 = arith.addf %87, %86 : vector<1x1xf32>
      %cst_45 = arith.constant 2.000000e+00 : f32
      %92 = vector.broadcast %cst_45 : f32 to vector<1x1xf32>
      %93 = arith.mulf %92, %90 : vector<1x1xf32>
      %94 = arith.subf %91, %93 : vector<1x1xf32>
      %cst_46 = arith.constant 6.250000e-02 : f32
      %95 = vector.broadcast %cst_46 : f32 to vector<1x1xf32>
      %96 = arith.mulf %94, %95 : vector<1x1xf32>
      %c0_47 = arith.constant 0 : index
      %c0_48 = arith.constant 0 : index
      %97 = vector.load %arg2[%c0_47, %c0_48] : memref<1x1xf32, #tpu.memory_space<vmem>>, vector<1x1xf32>
      tpu.vector_store %arg2[%c0_47, %c0_48], %96 {strides = array<i32>} : memref<1x1xf32, #tpu.memory_space<vmem>>, vector<1x1xf32>,
    } else {
    }
    return
  }
  func.func @transform_0(%arg0: i32) -> (i32, i32) {
    %c0_i32 = arith.constant 0 : i32
    %c0_i32_0 = arith.constant 0 : i32
    return %arg0, %c0_i32 : i32, i32
  }
  func.func @transform_1(%arg0: i32) -> (i32, i32) {
    %c0_i32 = arith.constant 0 : i32
    %c0_i32_0 = arith.constant 0 : i32
    %c0_i32_1 = arith.constant 0 : i32
    return %c0_i32, %c0_i32_0 : i32, i32
  }
}

</mosaic_0001>

<bundles_post_ra>
// kernel: tpu_custom_call.1
= control target key start
LH: loop header
LB: loop body
LE: loop exit
PB: predicated region body
PF: predicated region fallthrough
CT: control target
= control target key end

     0   :  { %6 = vsyncpa [#allocation7], 0  ;;  %s352_s0 = inlined_call_operand.hbm [shape: f32[16,16], index: 0, kind: input, shape index: {}]   ;;  %s353_s1 = inlined_call_operand.hbm [shape: f32[1,1], index: 1, kind: output, shape index: {}]  }
   0x1   :  { %7 = vsyncpa [#allocation8], 0  ;;  %s278_s6 = smov [#allocation6]   ;;  %s230_s10 = scalar_lea.hbm %s352_s0, 256 }
   0x2   :  { %s13_s7 = sshll.u32 %s278_s6, 4  ;;  %p231_p0 = scmp.ne.s32.totalorder %s352_s0, %s230_s10  ;;  %s14_s7 = int_to_ptr.vmem [resolvable:$true] %s13_s7 }
   0x3   :  { %p234_p1 = scmp.lt.u32.totalorder %s230_s10, %s352_s0 }
   0x5   :  { %p236_p2 = pnand %p234_p1, %p231_p0 }
   0x7   :  { %239 = shalt.err (!%p236_p2)
}
   0x8   :  { %s240_s15 = scalar_lea.vmem %s14_s7, 256  ;;  %p245_p4 = scmp.lt.s32.totalorder %s14_s7, %s14_s7 }
   0x9   :  { %p241_p3 = scmp.ne.s32.totalorder %s14_s7, %s240_s15  ;;  %p246_p5 = scmp.lt.s32.totalorder %s240_s15, %s240_s15 }
   0xb   :  { %p247_p6 = por %p246_p5, %p245_p4 }
   0xd   :  { %p248_p7 = pnand %p247_p6, %p241_p3 }
   0xf   :  { %251 = shalt.err (!%p248_p7)
}
  0x10   :  { %s279_s16 = smov 128   ;;  %s280_s17 = smov 8  }
  0x11   :  { %19 = dma.hbm_to_vmem [thread:$0]  %s352_s0, 256, %s14_s7, [#allocation7], %s279_s16, %s279_s16, %s280_s17  }
  0x12   :  { %274 = dma.done.wait [#allocation7], 256  }
  0x13   :  { %275 = vsyncadd [#allocation7], 4294967040  ;;  %vm48_vm0 = vcmask 130048   ;;  %v306_v0 = vld [vmem:[#allocation6] sm:$0xff]  ;;  %v308_v1 = vld [vmem:[#allocation6 + $0x8] sm:$0xff]  ;;  %vm27_vm1 = vcmask 122880   ;;  %v36_v12 = vlaneseq }
  0x14   :  { %v49_v2 = vsel %vm48_vm0, %v306_v0, -inf  ;;  %v52_v3 = vsel %vm48_vm0, %v308_v1, -inf  ;;  %v281_v10 = vmov -1e+30   ;;  %v282_v45 = vmov 0.0   ;;  %s283_s22 = smov [#allocation9]  }
  0x15   :  { %50 = vmax.xlane.f32.xlu0 %v49_v2  ;;  %v118_v4 = vmax.f32 %v49_v2, %v52_v3  ;;  %28 = vst.msk [vmem:[#allocation2] sm:$0x1] %vm27_vm1, %v281_v10  ;;  %v37_v13 = vshrl.u32 %v36_v12, 7  ;;  %29 = vst.msk [vmem:[#allocation3] sm:$0x1] %vm27_vm1, %v282_v45  ;;  %v43_v56 = vand.u32 127, %v36_v12 }
  0x16   :  { %vm80_vm4 = vcmask 7168   ;;  %vm30_vm5 = vcmask 0   ;;  %s193_s23 = sshll.u32 %s283_s22, 4  ;;  %s194_s23 = int_to_ptr.vmem [resolvable:$true] %s193_s23 }
  0x17   :  { %v119_v5 = vrot.slane %v118_v4, 4  ;;  %v133_v15 = vsub.s32 0, %v37_v13  ;;  %v38_v55 = vadd.s32 8, %v37_v13  ;;  %vm98_vm2 = vcmp.eq.s32.totalorder %v37_v13, %v43_v56  ;;  %31 = vst.msk [vmem:[#allocation4] sm:$0x1] %vm30_vm5, %v282_v45  ;;  %s252_s24 = scalar_lea.vmem %s194_s23, 16  ;;  %p257_p9 = scmp.lt.s32.totalorder %s194_s23, %s194_s23 }
  0x18   :  { %v100_v57 = vsel %vm98_vm2, %v306_v0, 0.0  ;;  %32 = vst.msk [vmem:[#allocation5] sm:$0x1] %vm30_vm5, %v282_v45  ;;  %p253_p8 = scmp.ne.s32.totalorder %s194_s23, %s252_s24  ;;  %s256_s25 = scalar_lea.vmem %s194_s23, 32 }
  0x19   :  { %53 = vmax.xlane.f32.xlu0 %v52_v3  ;;  %v120_v6 = vmax.f32 %v118_v4, %v119_v5  ;;  %vm99_vm3 = vcmp.eq.s32.totalorder %v38_v55, %v43_v56  ;;  %v102_v59 = vsel %vm48_vm0, %v100_v57, 0.0  ;;  %p258_p10 = scmp.lt.s32.totalorder %s256_s25, %s252_s24 }
  0x1a   :  { %v101_v58 = vsel %vm99_vm3, %v308_v1, 0.0 }
  0x1b   :  { %v121_v7 = vrot.slane %v120_v6, 2  ;;  %v103_v60 = vsel %vm48_vm0, %v101_v58, 0.0  ;;  %p259_p11 = por %p258_p10, %p257_p9 }
  0x1c   :  { %v117_v14 = vld [vmem:[#allocation2] sm:$0x1]  ;;  %v153_v51 = vld [vmem:[#allocation3] sm:$0x1]  ;;  %v104_v61 = vadd.f32 %v103_v60, %v102_v59 }
  0x1d   :  { %v122_v8 = vmax.f32 %v120_v6, %v121_v7  ;;  %p260_p12 = pnand %p259_p11, %p253_p8 }
  0x1f   :  { %v123_v9 = vrot.slane %v122_v8, 1 }
  0x21   :  { %v124_v11 = vmax.f32 %v122_v8, %v123_v9 }
  0x23   :  { %v125_v16 = vmax.f32 %v117_v14, %v124_v11 }
  0x25   :  { %v134_v19 = vrot.slane %v125_v16, %v133_v15  ;;  %158 = vst.msk [vmem:[#allocation2] sm:$0x1] %vm27_vm1, %v125_v16  ;;  %v126_v32 = vsub.f32 %v117_v14, %v125_v16 }
  0x27   :  { %v136_v21 = vsub.f32 %v306_v0, %v134_v19  ;;  %v137_v22 = vsub.f32 %v308_v1, %v134_v19  ;;  %v127_v35 = vmul.f32 20.0, %v126_v32 }
  0x29   :  { %v138_v26 = vmul.f32 20.0, %v136_v21  ;;  %v139_v27 = vmul.f32 20.0, %v137_v22  ;;  %v128_v38 = vmul.f32 1.442695, %v127_v35 }
  0x2b   :  { %v140_v29 = vmul.f32 1.442695, %v138_v26  ;;  %v142_v30 = vmul.f32 1.442695, %v139_v27 }
  0x2c   :  { %v162_v6 = vld [vmem:[#allocation2] sm:$0x1] }
  0x2d   :  { %v163_v10 = vmul.f32 20.0, %v162_v6 }
  0xa2   :  { %v315_v17 = vpop.xlane.xlu0 %50 }
  0xa3   :  { %v55_v18 = vsub.f32 %v306_v0, %v315_v17  ;;  %v69_v0 = vmul.f32 20.0, %v315_v17 }
  0xa5   :  { %v57_v20 = vmul.f32 20.0, %v55_v18 }
  0xa6   :  { %v54_v23 = vpop.xlane.xlu0 %53 }
  0xa7   :  { %v59_v24 = vmul.f32 1.442695, %v57_v20  ;;  %v56_v25 = vsub.f32 %v308_v1, %v54_v23  ;;  %v70_v1 = vmul.f32 20.0, %v54_v23 }
  0xa9   :  { %214 = vpow2.f32 %v59_v24  ;;  %v58_v28 = vmul.f32 20.0, %v56_v25 }
  0xaa   :  { %216 = vpow2.f32 %v140_v29 }
  0xab   :  { %v61_v31 = vmul.f32 1.442695, %v58_v28  ;;  %218 = vpow2.f32 %v142_v30 }
  0xad   :  { %220 = vpow2.f32 %v61_v31 }
  0xae   :  { %222 = vpow2.f32 %v128_v38 }
  0xb3   :  { %v215_v33 = vpop.eup %214 }
  0xb4   :  { %v63_v34 = vsel %vm48_vm0, %v215_v33, 0.0  ;;  %v217_v36 = vpop.eup %216 }
  0xb5   :  { %64 = vadd.xlane.f32.xlu1 %v63_v34  ;;  %v219_v37 = vpop.eup %218  ;;  %v144_v39 = vsel %vm48_vm0, %v217_v36, 0.0 }
  0xb6   :  { %v145_v41 = vsel %vm48_vm0, %v219_v37, 0.0 }
  0xb7   :  { %v221_v40 = vpop.eup %220  ;;  %v146_v43 = vadd.f32 %v145_v41, %v144_v39  ;;  %v77_v39 = vld [vmem:[#allocation4] sm:$0x1] }
  0xb8   :  { %v66_v42 = vsel %vm48_vm0, %v221_v40, 0.0  ;;  %v223_v49 = vpop.eup %222  ;;  %v97_v40 = vld [vmem:[#allocation5] sm:$0x1] }
  0xb9   :  { %67 = vadd.xlane.f32.xlu1 %v66_v42  ;;  %v147_v44 = vrot.slane %v146_v43, 4  ;;  %v154_v52 = vmul.f32 %v223_v49, %v153_v51 }
  0xbb   :  { %v148_v46 = vadd.f32 %v147_v44, %v146_v43 }
  0xbd   :  { %v149_v47 = vrot.slane %v148_v46, 2  ;;  %105 = vadd.xlane.f32.xlu1 %v104_v61 }
  0xbf   :  { %v150_v48 = vadd.f32 %v149_v47, %v148_v46 }
  0xc1   :  { %v151_v50 = vrot.slane %v150_v48, 1 }
  0xc3   :  { %v152_v53 = vadd.f32 %v151_v50, %v150_v48 }
  0xc5   :  { %v155_v54 = vadd.f32 %v154_v52, %v152_v53 }
  0xc7   :  { %157 = vst.msk [vmem:[#allocation3] sm:$0x1] %vm27_vm1, %v155_v54 }
  0xce   :  { %v164_v63 = vld [vmem:[#allocation3] sm:$0x1] }
 0x142   :  { %v65_v62 = vpop.xlane.xlu1 %64 }
 0x143   :  { %224 = vlog2.f32 %v65_v62 }
 0x144   :  { %226 = vlog2.f32 %v164_v63 }
 0x146   :  { %v68_v2 = vpop.xlane.xlu1 %67 }
 0x147   :  { %228 = vlog2.f32 %v68_v2 }
 0x14a   :  { %v106_v17 = vpop.xlane.xlu1 %105 }
 0x14b   :  { %v107_v19 = vrot.slane %v106_v17, 4 }
 0x14d   :  { %v225_v3 = vpop.eup %224  ;;  %v108_v20 = vadd.f32 %v107_v19, %v106_v17 }
 0x14e   :  { %v72_v4 = vmul.f32 0.6931472, %v225_v3  ;;  %v227_v5 = vpop.eup %226 }
 0x14f   :  { %v166_v11 = vmul.f32 0.6931472, %v227_v5  ;;  %v109_v21 = vrot.slane %v108_v20, 2 }
 0x150   :  { %v75_v9 = vadd.f32 %v72_v4, %v69_v0 }
 0x151   :  { %v229_v7 = vpop.eup %228  ;;  %v167_v15 = vadd.f32 %v166_v11, %v163_v10  ;;  %v110_v25 = vadd.f32 %v109_v21, %v108_v20 }
 0x152   :  { %v74_v8 = vmul.f32 0.6931472, %v229_v7  ;;  %v81_v13 = vsel %vm80_vm4, %v75_v9, 0.0 }
 0x153   :  { %v168_v18 = vsel %vm27_vm1, %v167_v15, 0.0  ;;  %v111_v31 = vrot.slane %v110_v25, 1 }
 0x154   :  { %v76_v12 = vadd.f32 %v74_v8, %v70_v1 }
 0x155   :  { %v112_v36 = vadd.f32 %v111_v31, %v110_v25 }
 0x156   :  { %v82_v14 = vsel %vm80_vm4, %v76_v12, 0.0 }
 0x157   :  { %v83_v16 = vadd.f32 %v82_v14, %v81_v13 }
 0x159   :  { %84 = vadd.xlane.f32.xlu0 %v83_v16 }
 0x15d   :  { %169 = vadd.xlane.f32.xlu0 %v168_v18 }
 0x1e6   :  { %v85_v22 = vpop.xlane.xlu0 %84 }
 0x1e7   :  { %v86_v23 = vrot.slane %v85_v22, 4 }
 0x1e9   :  { %v87_v24 = vadd.f32 %v86_v23, %v85_v22 }
 0x1ea   :  { %v170_v26 = vpop.xlane.xlu0 %169 }
 0x1eb   :  { %v88_v27 = vrot.slane %v87_v24, 2  ;;  %v171_v28 = vrot.slane %v170_v26, 4 }
 0x1ed   :  { %v172_v29 = vadd.f32 %v171_v28, %v170_v26  ;;  %v89_v30 = vadd.f32 %v88_v27, %v87_v24 }
 0x1ef   :  { %v173_v32 = vrot.slane %v172_v29, 2  ;;  %v90_v33 = vrot.slane %v89_v30, 1 }
 0x1f1   :  { %v174_v34 = vadd.f32 %v173_v32, %v172_v29  ;;  %v91_v35 = vadd.f32 %v90_v33, %v89_v30 }
 0x1f3   :  { %202 = vpush %v91_v35  ;;  %v175_v37 = vrot.slane %v174_v34, 1 }
 0x1f4   :  { %204 = vpush %v112_v36 }
 0x1f5   :  { %v176_v38 = vadd.f32 %v175_v37, %v174_v34 }
 0x1f7   :  { %206 = vpush %v176_v38 }
 0x224   :  { %s203_s0 = spop %202 }
 0x225   :  { %v93_v41 = vstv %s203_s0  ;;  %s205_s20 = spop %204 }
 0x226   :  { %v94_v42 = vadd.f32 %v93_v41, %v77_v39  ;;  %v114_v43 = vstv %s205_s20 }
 0x227   :  { %v115_v44 = vadd.f32 %v114_v43, %v97_v40 }
 0x228   :  { %96 = vst.msk [vmem:[#allocation4] sm:$0x1] %vm30_vm5, %v94_v42  ;;  %s207_s21 = spop %206 }
 0x229   :  { %116 = vst.msk [vmem:[#allocation5] sm:$0x1] %vm30_vm5, %v115_v44  ;;  %v178_v48 = vstv %s207_s21 }
 0x22f   :  { %v179_v45 = vld [vmem:[#allocation4] sm:$0x1] }
 0x230   :  { %v180_v46 = vld [vmem:[#allocation5] sm:$0x1]  ;;  %v182_v49 = vadd.f32 %v179_v45, %v178_v48 }
 0x231   :  { %v181_v47 = vmul.f32 20.0, %v180_v46 }
 0x233   :  { %v183_v50 = vmul.f32 2.0, %v181_v47 }
 0x235   :  { %v184_v51 = vsub.f32 %v182_v49, %v183_v50 }
 0x237   :  { %v185_v52 = vmul.f32 0.0625, %v184_v51 }
 0x239   :  { %186 = vst.msk [vmem:[#allocation9] sm:$0x1] %vm30_vm5, %v185_v52 }
 0x23a   :  { %263 = shalt.err (!%p260_p12)
}
 0x23b   :  { %s264_s28 = scalar_lea.hbm %s353_s1, 16 }
 0x23c   :  { %p265_p13 = scmp.ne.s32.totalorder %s353_s1, %s264_s28  ;;  %p268_p0 = scmp.lt.u32.totalorder %s264_s28, %s353_s1 }
 0x23e   :  { %p270_p1 = pnand %p268_p0, %p265_p13 }
 0x240   :  { %273 = shalt.err (!%p270_p1)
}
 0x241   :  { %196 = dma.vmem_to_hbm [thread:$0]  %s194_s23, 16, %s353_s1, [#allocation8]  }
 0x242   :  { %276 = dma.done.wait [#allocation8], 16  }
 0x243   :  { %277 = vsyncadd [#allocation8], 4294967280 }
 0x244   :  { %200 = vsyncpa [#allocation7], 1 }
 0x245   :  { %201 = vsyncpa [#allocation8], 1 }

</bundles_post_ra>
